<compile_context>
chip_gen: v7x
topology: tpu7x:2x2x1
jax: 0.10.0
libtpu: 0.0.40
codegen_flags: <defaults>
</compile_context>

<pallas_src>
import functools

import jax
import jax.numpy as jnp
from jax.experimental import pallas as pl
from jax.experimental.pallas import tpu as pltpu


# 2048 packed rows/step = 16384 logical rows: 2 MiB x-tile + 1 MiB out-tile,
# in the measured >=85%-of-roofline regime; double-buffered IO + the kernel's
# f32 temporaries stay well under the 64 MiB v7x VMEM (and far under v5e/v6e).
_PACKED_TILE_CAP = 2048
_VMEM_LIMIT_BYTES = 40 * 1024 * 1024


def _recip(x):
    # EUP approximate reciprocal + one Newton step: ~f32 accurate, keeps the
    # divide off the VALU.  0 still yields inf -> NaN (matches torch's 0/0).
    r = pl.reciprocal(x, approx=True)
    return r * (2.0 - x * r)


@functools.lru_cache(maxsize=None)
def _roll_moves_to_higher_lanes():
    """Probe pltpu.roll's rotate direction once (tiny kernel, run at init).

    True -> pltpu.roll(x, +1, axis=-1) matches jnp.roll (values move toward
    higher lane indices).  The segmented reductions below adapt to either
    convention, so the main kernel is correct regardless.
    """
    def probe(x_ref, o_ref):
        o_ref[...] = pltpu.roll(x_ref[...], shift=1, axis=1)

    x = jax.lax.broadcasted_iota(jnp.float32, (8, 128), 1)
    y = pl.pallas_call(
        probe, out_shape=jax.ShapeDtypeStruct((8, 128), jnp.float32))(x)
    return bool(y[0, 1] == 0.0)


# ---------------------------------------------------------------------------
# Kernel
# ---------------------------------------------------------------------------
def _fused_lintrans_kernel(x_ref, w_ref, b_ref, s_ref, o_ref, *, seg, roll_fwd):
    """One fused step on a lane-dense tile.

    x_ref: [tm_p, pack*d_in]  -- `pack` logical rows packed per vreg row
    w_ref: [pack*d_in, 128]   -- block-diagonal composed weight (VMEM-resident)
    b_ref: [1, 128]           -- tiled composed bias
    s_ref: [128, 128]         -- block-of-ones segment-sum matrix
    o_ref: [tm_p, 128]        -- lane-dense output (pack rows of width seg)
    """
    f32 = jnp.float32
    # The whole nn.Linear stack collapsed into one MXU matmul.
    z = jnp.dot(x_ref[...], w_ref[...], preferred_element_type=f32) + b_ref[...]

    nlanes = z.shape[-1]
    lane = jax.lax.broadcasted_iota(jnp.int32, z.shape, dimension=1)

    if roll_fwd:   # pltpu.roll == jnp.roll convention
        pull_up = lambda r, s: pltpu.roll(r, shift=nlanes - s, axis=1)  # r[i+s]
        pull_dn = lambda r, s: pltpu.roll(r, shift=s, axis=1)           # r[i-s]
    else:          # flipped convention
        pull_up = lambda r, s: pltpu.roll(r, shift=s, axis=1)
        pull_dn = lambda r, s: pltpu.roll(r, shift=nlanes - s, axis=1)

    def seg_allreduce(v, op):
        # (1) windowed rotate-reduce: after log2(seg) steps the FIRST lane of
        #     every seg-lane segment holds the full within-segment reduction.
        r = v
        s = 1
        while s < seg:
            r = op(r, pull_up(r, s))
            s *= 2
        # (2) broadcast each segment-leader value to the rest of its segment.
        s = 1
        while s < seg:
            r = jnp.where((lane & s) != 0, pull_dn(r, s), r)
            s *= 2
        return r

    # Per-logical-row min-max scale (LinTrans.scale).
    zmax = seg_allreduce(z, jnp.maximum)
    zmin = seg_allreduce(z, jnp.minimum)
    inv_span = _recip(zmax - zmin)          # NaN for constant rows, as in torch
    zc = z - zmin
    z_std = zc * inv_span

    # Per-logical-row L2 normalize (F.normalize, dim=1, eps=1e-12).
    # Segment-sum of the *finite* centered squares uses the otherwise-idle MXU
    # (the block-of-ones matmul also broadcasts the sum across the segment);
    # scaling by inv_span^2 afterwards keeps constant-row NaNs in their row.
    sumsq = jnp.dot(zc * zc, s_ref[...], preferred_element_type=f32)
    sumsq = sumsq * (inv_span * inv_span)
    o_ref[...] = (z_std * jax.lax.rsqrt(jnp.maximum(sumsq, 1e-24))
                  ).astype(o_ref.dtype)


# ---------------------------------------------------------------------------
# Wrapper
# ---------------------------------------------------------------------------
def _packed_row_tile(n_p):
    """Packed rows per grid step (n_p is already a multiple of 8)."""
    if n_p <= 16:
        return n_p                      # tiny input: single full block
    # >=2 grid steps so ("parallel",) can shard across v7x's two TensorCores;
    # round to the 8-sublane granule; cap so the double-buffered IO + f32
    # temporaries fit every generation's VMEM.
    half = -(-n_p // 2)
    return min(((half + 7) // 8) * 8, _PACKED_TILE_CAP)


def build_packed_params(layer_params):
    """Compose the linear stack and build lane-dense packed parameters.

    layer_params: list of (wt, b) with wt = [d_in_i, d_out_i] (torch W.T) and
    b = [d_out_i].  Returns (w_bd [pack*d_in, 128], b_tiled [1, 128],
    seg_ones [128, 128]) with pack = 128 // d_out.
    """
    wt0, b0 = layer_params[0]
    w_total = wt0
    b_total = b0.reshape(1, -1)
    for wt, b in layer_params[1:]:
        # No nonlinearity between layers -> the whole stack is one affine map.
        w_total = w_total @ wt
        b_total = b_total @ wt + b.reshape(1, -1)

    d_out = w_total.shape[1]
    if d_out > 128 or (d_out & (d_out - 1)) != 0:
        # TODO(synk): non-power-of-two / >128-wide outputs need a different
        # lane packing; not implemented (the module's demo dims use d_out=16).
        raise NotImplementedError("d_out must be a power of two <= 128")
    pack = 128 // d_out

    eye = jnp.eye(pack, dtype=w_total.dtype)
    w_bd = jnp.kron(eye, w_total)                                    # [pack*d_in, 128]
    b_tiled = jnp.tile(b_total, (1, pack))                           # [1, 128]
    seg_ones = jnp.kron(eye, jnp.ones((d_out, d_out), w_total.dtype))  # [128, 128]
    return w_bd, b_tiled, seg_ones


def lintrans_forward(x, packed_params):
    """x: [N, d_in] f32 -> [N, d_out] f32 (min-max scaled + L2 normalized)."""
    w_bd, b_tiled, seg_ones = packed_params
    n, d_in = x.shape
    pack = w_bd.shape[0] // d_in
    d_out = w_bd.shape[1] // pack

    # Pad the batch so the packed view is a whole number of 8-sublane rows;
    # padded rows are computed (cheap, finite) and sliced off below.
    gran = 8 * pack
    n_pad = -(-n // gran) * gran
    if n_pad != n:
        x = jnp.pad(x, ((0, n_pad - n), (0, 0)))
    n_p = n_pad // pack

    # Free row-major reshapes: [N, d_in] <-> [N/pack, pack*d_in] and
    # [N/pack, 128] <-> [N, d_out].
    x_packed = x.reshape(n_p, pack * d_in)

    tm_p = _packed_row_tile(n_p)
    grid = (pl.cdiv(n_p, tm_p),)

    kernel = functools.partial(
        _fused_lintrans_kernel, seg=d_out,
        roll_fwd=_roll_moves_to_higher_lanes())

    out_packed = pl.pallas_call(
        kernel,
        out_shape=jax.ShapeDtypeStruct((n_p, pack * d_out), jnp.float32),
        grid=grid,
        in_specs=[
            pl.BlockSpec((tm_p, pack * d_in), lambda i: (i, 0)),
            pl.BlockSpec(w_bd.shape, lambda i: (0, 0)),     # VMEM-resident
            pl.BlockSpec(b_tiled.shape, lambda i: (0, 0)),
            pl.BlockSpec(seg_ones.shape, lambda i: (0, 0)),
        ],
        out_specs=pl.BlockSpec((tm_p, pack * d_out), lambda i: (i, 0)),
        compiler_params=pltpu.CompilerParams(
            dimension_semantics=("parallel",),
            vmem_limit_bytes=_VMEM_LIMIT_BYTES,
        ),
    )(x_packed, w_bd, b_tiled, seg_ones)

    out = out_packed.reshape(n_pad, d_out)
    return out[:n] if n_pad != n else out


class LinTransPallas:
    """JAX/Pallas re-implementation of the PyTorch LinTrans module."""

    def __init__(self, layers, dims, key):
        self.layer_params = []
        for i in range(layers):
            key, wk, bk = jax.random.split(key, 3)
            bound = 1.0 / (float(dims[i]) ** 0.5)
            # Mirrors torch.nn.Linear's U(-1/sqrt(fan_in), 1/sqrt(fan_in)).
            w = jax.random.uniform(
                wk, (dims[i + 1], dims[i]), jnp.float32, -bound, bound)
            b = jax.random.uniform(
                bk, (dims[i + 1],), jnp.float32, -bound, bound)
            self.layer_params.append((jnp.asarray(w.T), b))
        # Pre-composed, lane-dense packed parameters (built once at init).
        self.packed_params = build_packed_params(self.layer_params)
        # Warm the roll-direction probe outside of jit tracing.
        _roll_moves_to_higher_lanes()

    @functools.partial(jax.jit, static_argnums=0)
    def __call__(self, x):
        return lintrans_forward(x, self.packed_params)


# ---------------------------------------------------------------------------
# Pure-JAX reference (layer-by-layer, faithful to the PyTorch module)
# ---------------------------------------------------------------------------
def reference_forward(layer_params, x):
    out = x
    for wt, b in layer_params:
        out = out @ wt + b
    zmax = out.max(axis=1, keepdims=True)
    zmin = out.min(axis=1, keepdims=True)
    z_std = (out - zmin) / (zmax - zmin)
    norm = jnp.sqrt(jnp.sum(z_std * z_std, axis=1, keepdims=True))
    return z_std / jnp.maximum(norm, 1e-12)


if __name__ == "__main__":
    key = jax.random.PRNGKey(0)
    key, xk, x2k, pk = jax.random.split(key, 4)

    # Shapes consistent with the module: 2 linear layers, dims [32, 64, 16].
    layers = 2
    dims = [32, 64, 16]
    model = LinTransPallas(layers, dims, pk)

    # Small demo batch.
    n = 8
    x = jax.random.normal(xk, (n, dims[0]), jnp.float32)
    out = jax.block_until_ready(model(x))
    ref = reference_forward(model.layer_params, x)
    assert out.shape == (n, dims[-1])
    assert jnp.allclose(out, ref, atol=1e-4, rtol=1e-4), float(
        jnp.max(jnp.abs(out - ref)))

    # A non-multiple-of-8 batch exercises wrapper padding, a multi-step
    # ("parallel") grid and a partial last block.
    n2 = 317
    x2 = jax.random.normal(x2k, (n2, dims[0]), jnp.float32)
    out2 = jax.block_until_ready(model(x2))
    ref2 = reference_forward(model.layer_params, x2)
    assert out2.shape == (n2, dims[-1])
    assert jnp.allclose(out2, ref2, atol=1e-4, rtol=1e-4), float(
        jnp.max(jnp.abs(out2 - ref2)))

    print("KERNEL_OK")
</pallas_src>

<mosaic_0001>
module attributes {stable_mosaic.version = 11 : i64} {
  func.func @probe(%arg0: memref<8x128xf32, #tpu.memory_space<vmem>>, %arg1: memref<8x128xf32, #tpu.memory_space<vmem>>) attributes {dimension_semantics = [], scalar_prefetch = 0 : i64, scratch_operands = 0 : i64, tpu.core_type = #tpu.core_type<tc>} {
    %c0 = arith.constant 0 : index
    %c0_0 = arith.constant 0 : index
    %0 = vector.load %arg0[%c0, %c0_0] : memref<8x128xf32, #tpu.memory_space<vmem>>, vector<8x128xf32>
    %c1_i32 = arith.constant 1 : i32
    %1 = tpu.dynamic_rotate %0 by %c1_i32 dim 1 : vector<8x128xf32>, i32 -> vector<8x128xf32>
    %c0_1 = arith.constant 0 : index
    %c0_2 = arith.constant 0 : index
    %2 = vector.load %arg1[%c0_1, %c0_2] : memref<8x128xf32, #tpu.memory_space<vmem>>, vector<8x128xf32>
    tpu.vector_store %arg1[%c0_1, %c0_2], %1 {strides = array<i32>} : memref<8x128xf32, #tpu.memory_space<vmem>>, vector<8x128xf32>,
    return
  }
}

</mosaic_0001>

<bundles_post_ra>
// kernel: tpu_custom_call.1
= control target key start
LH: loop header
LB: loop body
LE: loop exit
PB: predicated region body
PF: predicated region fallthrough
CT: control target
= control target key end

     0   :  { %6 = vsyncpa [#allocation3], 0  ;;  %s128_s0 = inlined_call_operand.hbm [shape: f32[8,128], index: 0, kind: input, shape index: {}]   ;;  %s129_s1 = inlined_call_operand.hbm [shape: f32[8,128], index: 1, kind: output, shape index: {}]  }
   0x1   :  { %7 = vsyncpa [#allocation4], 0  ;;  %s91_s6 = smov [#allocation2]   ;;  %s43_s10 = scalar_lea.hbm %s128_s0, 128 }
   0x2   :  { %s14_s7 = sshll.u32 %s91_s6, 4  ;;  %p44_p0 = scmp.ne.s32.totalorder %s128_s0, %s43_s10  ;;  %s15_s7 = int_to_ptr.vmem [resolvable:$true] %s14_s7 }
   0x3   :  { %p47_p1 = scmp.lt.u32.totalorder %s43_s10, %s128_s0 }
   0x5   :  { %p49_p2 = pnand %p47_p1, %p44_p0 }
   0x7   :  { %52 = shalt.err (!%p49_p2)
}
   0x8   :  { %s53_s15 = scalar_lea.vmem %s15_s7, 128  ;;  %p58_p4 = scmp.lt.s32.totalorder %s15_s7, %s15_s7 }
   0x9   :  { %p54_p3 = scmp.ne.s32.totalorder %s15_s7, %s53_s15  ;;  %p59_p5 = scmp.lt.s32.totalorder %s53_s15, %s53_s15 }
   0xb   :  { %p60_p6 = por %p59_p5, %p58_p4 }
   0xd   :  { %p61_p7 = pnand %p60_p6, %p54_p3 }
   0xf   :  { %64 = shalt.err (!%p61_p7)
}
  0x10   :  { %17 = dma.hbm_to_vmem [thread:$0]  %s128_s0, 128, %s15_s7, [#allocation3]  }
  0x11   :  { %87 = dma.done.wait [#allocation3], 128  }
  0x12   :  { %88 = vsyncadd [#allocation3], 4294967168  ;;  %v21_v0 = vld [vmem:[#allocation2] sm:$0xff]  ;;  %s92_s18 = smov 1   ;;  %s93_s19 = smov [#allocation5]  }
  0x13   :  { %22 = vrot.lane.b32.xlu0 %v21_v0, %s92_s18  ;;  %s31_s20 = sshll.u32 %s93_s19, 4  ;;  %s32_s20 = int_to_ptr.vmem [resolvable:$true] %s31_s20 }
  0x14   :  { %s65_s21 = scalar_lea.vmem %s32_s20, 128  ;;  %p70_p9 = scmp.lt.s32.totalorder %s32_s20, %s32_s20 }
  0x15   :  { %p66_p8 = scmp.ne.s32.totalorder %s32_s20, %s65_s21  ;;  %p71_p10 = scmp.lt.s32.totalorder %s65_s21, %s65_s21 }
  0x17   :  { %p72_p11 = por %p71_p10, %p70_p9 }
  0x19   :  { %p73_p12 = pnand %p72_p11, %p66_p8 }
  0x85   :  { %v23_v1 = vpop.permute.xlu0 %22 }
  0x86   :  { %24 = vst [vmem:[#allocation5] sm:$0xff] %v23_v1 }
  0x87   :  { %76 = shalt.err (!%p73_p12)
}
  0x88   :  { %s77_s0 = scalar_lea.hbm %s129_s1, 128 }
  0x89   :  { %p78_p13 = scmp.ne.s32.totalorder %s129_s1, %s77_s0  ;;  %p81_p0 = scmp.lt.u32.totalorder %s77_s0, %s129_s1 }
  0x8b   :  { %p83_p1 = pnand %p81_p0, %p78_p13 }
  0x8d   :  { %86 = shalt.err (!%p83_p1)
}
  0x8e   :  { %34 = dma.vmem_to_hbm [thread:$0]  %s32_s20, 128, %s129_s1, [#allocation4]  }
  0x8f   :  { %89 = dma.done.wait [#allocation4], 128  }
  0x90   :  { %90 = vsyncadd [#allocation4], 4294967168 }
  0x91   :  { %38 = vsyncpa [#allocation3], 1 }
  0x92   :  { %39 = vsyncpa [#allocation4], 1 }

</bundles_post_ra>
